<compile_context>
chip_gen: v6e
topology: v6e:2x2x1
jax: 0.10.0
libtpu: 0.0.40
codegen_flags: <defaults>
</compile_context>

<pallas_src>
import functools

import jax
import jax.numpy as jnp
from jax import lax
from jax.experimental import pallas as pl
from jax.experimental.pallas import tpu as pltpu


def _ensemble_kernel(scale_ref, xr_ref, xc_ref, sqr_ref, sqc_ref, w_ref, *,
                     num_kernels):
    xr = xr_ref[...].astype(jnp.float32)                          # (tm, D)
    xc = xc_ref[...].astype(jnp.float32)                          # (tn, D)

    # 2 * (Xr @ Xc.T): fold the 2 into the (small) LHS tile, contract the
    # feature dim of both tiles on the MXU (no explicit transpose).
    g2 = lax.dot_general(
        xr * 2.0, xc,
        dimension_numbers=(((1,), (1,)), ((), ())),
        preferred_element_type=jnp.float32)                       # (tm, tn)

    # Negative squared distance tile: -(|xr|^2 + |xc|^2 - 2 xr.xc).
    nd = (g2 - sqr_ref[...]) - sqc_ref[...]                       # (tm, tn)

    # Unrolled over the (small) ensemble: one mul + one exp per element.
    # scale_k = alpha_k^2 / eps_k^2 (alpha_decay) or 1 / eps_k^2 (gaussian),
    # precomputed host-side so the element path is mul + exp only.
    for k in range(num_kernels):
        s = scale_ref[k]
        w_ref[k] = jnp.exp(nd * s).astype(w_ref.dtype)


def graph_ensemble_forward(point_cloud, epsilons, alphas, kernel_type,
                           num_kernels, *, tm=128, tn=256,
                           out_dtype=jnp.float32):
    """Returns (W_stack, graphs): W_stack is (num_kernels, N, N); graphs is a
    list of dicts mirroring torch_geometric Data objects."""
    n, d = point_cloud.shape
    tm = min(tm, n)
    tn = min(tn, n)
    # Tile constraints: tm multiple of 8 (or == N), tn multiple of 128 (or == N).
    assert n % tm == 0 and n % tn == 0, "N must be divisible by the tile sizes"

    eps2 = epsilons.astype(jnp.float32) ** 2
    if kernel_type == "alpha_decay":
        # Fold the pow into the exponent: exp(-d/eps^2)^(alpha^2) == exp(-d*alpha^2/eps^2).
        scales = (alphas.astype(jnp.float32) ** 2) / eps2
    elif kernel_type == "gaussian":
        scales = 1.0 / eps2
    else:
        raise ValueError(f"unknown kernel_type: {kernel_type}")

    x32 = point_cloud.astype(jnp.float32)
    # Squared norms, computed once (O(N*D)) instead of per tile in-kernel.
    sq = jnp.sum(x32 * x32, axis=-1)                               # (N,)
    sq_row = sq.reshape(n, 1)                                      # (N, 1)
    sq_col = sq.reshape(1, n)                                      # (1, N)

    kernel = functools.partial(_ensemble_kernel, num_kernels=num_kernels)

    w_stack = pl.pallas_call(
        kernel,
        out_shape=jax.ShapeDtypeStruct((num_kernels, n, n), out_dtype),
        grid_spec=pltpu.PrefetchScalarGridSpec(
            num_scalar_prefetch=0,
            grid=(n // tm, n // tn),
            in_specs=[
                pl.BlockSpec(memory_space=pltpu.MemorySpace.SMEM),   # scales
                pl.BlockSpec((tm, d), lambda i, j: (i, 0)),          # X row tile
                pl.BlockSpec((tn, d), lambda i, j: (j, 0)),          # X col tile
                pl.BlockSpec((tm, 1), lambda i, j: (i, 0)),          # |x|^2 rows
                pl.BlockSpec((1, tn), lambda i, j: (0, j)),          # |x|^2 cols
            ],
            out_specs=pl.BlockSpec((num_kernels, tm, tn),
                                   lambda i, j: (0, i, j)),
        ),
        compiler_params=pltpu.CompilerParams(
            # No grid-carried state -> both tile axes are independent; v7x
            # shards them across its 2 TensorCores, harmless on v5e/v6e.
            dimension_semantics=("parallel", "parallel"),
        ),
    )(scales, x32, x32, sq_row, sq_col)

    # --- glue: dense_to_sparse + Data equivalents (plain JAX) ---
    # exp(.) is strictly positive, so every entry of W is a nonzero edge.
    rows = jnp.repeat(jnp.arange(n, dtype=jnp.int32), n)
    cols = jnp.tile(jnp.arange(n, dtype=jnp.int32), n)
    edge_index = jnp.stack([rows, cols], axis=0)                  # (2, N*N)
    graphs = []
    for i in range(num_kernels):
        graphs.append({
            "x": x32,
            "edge_index": edge_index,
            "edge_attr": w_stack[i].reshape(-1),
        })
    # TODO(synk): torch_geometric.data.Data object construction itself has no
    # Pallas/JAX equivalent; dict-of-arrays stands in for it.
    return w_stack, graphs


def _reference(point_cloud, epsilons, alphas, kernel_type, num_kernels):
    x = point_cloud.astype(jnp.float32)
    g = x @ x.T
    diag = jnp.diag(g)
    dist = diag[None, :] + diag[:, None] - 2.0 * g
    ws = []
    for i in range(num_kernels):
        w = jnp.exp(-(dist / (epsilons[i] ** 2)))
        if kernel_type == "alpha_decay":
            w = w ** (alphas[i] ** 2)
        ws.append(w)
    return jnp.stack(ws, axis=0)


if __name__ == "__main__":
    N, D = 512, 32          # module uses D=29; 32 keeps the proven pad-friendly path
    NUM_KERNELS = 3
    KERNEL_TYPE = "alpha_decay"

    key = jax.random.PRNGKey(0)
    point_cloud = jax.random.normal(key, (N, D), dtype=jnp.float32)

    # nn.Parameter(torch.ones(num_kernels)) for both epsilons and alphas.
    epsilons = jnp.ones((NUM_KERNELS,), dtype=jnp.float32)
    alphas = jnp.ones((NUM_KERNELS,), dtype=jnp.float32)

    w_stack, graphs = graph_ensemble_forward(
        point_cloud, epsilons, alphas, KERNEL_TYPE, NUM_KERNELS)
    w_stack = jax.block_until_ready(w_stack)

    w_ref = _reference(point_cloud, epsilons, alphas, KERNEL_TYPE, NUM_KERNELS)
    assert w_stack.shape == (NUM_KERNELS, N, N)
    # The folded exponent changes rounding slightly vs exp-then-pow; keep a
    # modest tolerance.
    assert jnp.allclose(w_stack, w_ref, atol=1e-5, rtol=1e-5), "mismatch vs reference"
    assert graphs[0]["edge_index"].shape == (2, N * N)
    assert graphs[0]["edge_attr"].shape == (N * N,)

    print("KERNEL_OK")
</pallas_src>

<mosaic_0001>
module attributes {stable_mosaic.version = 11 : i64} {
  func.func @_ensemble_kernel(%arg0: i32, %arg1: i32, %arg2: memref<3xf32, #tpu.memory_space<smem>>, %arg3: memref<128x32xf32, #tpu.memory_space<vmem>>, %arg4: memref<256x32xf32, #tpu.memory_space<vmem>>, %arg5: memref<128x1xf32, #tpu.memory_space<vmem>>, %arg6: memref<1x256xf32, #tpu.memory_space<vmem>>, %arg7: memref<3x128x256xf32, #tpu.memory_space<vmem>>) attributes {dimension_semantics = [#tpu.dimension_semantics<parallel>, #tpu.dimension_semantics<parallel>], iteration_bounds = array<i64: 4, 2>, scalar_prefetch = 0 : i64, scratch_operands = 0 : i64, tpu.core_type = #tpu.core_type<tc>, window_params = [{transform_indices = @transform_0, window_bounds = array<i64: 3>}, {transform_indices = @transform_1, window_bounds = array<i64: 128, 32>}, {transform_indices = @transform_2, window_bounds = array<i64: 256, 32>}, {transform_indices = @transform_3, window_bounds = array<i64: 128, 1>}, {transform_indices = @transform_4, window_bounds = array<i64: 1, 256>}, {transform_indices = @transform_5, window_bounds = array<i64: 3, 128, 256>}]} {
    %c0 = arith.constant 0 : index
    %c0_0 = arith.constant 0 : index
    %0 = vector.load %arg3[%c0, %c0_0] : memref<128x32xf32, #tpu.memory_space<vmem>>, vector<128x32xf32>
    %c0_1 = arith.constant 0 : index
    %c0_2 = arith.constant 0 : index
    %1 = vector.load %arg4[%c0_1, %c0_2] : memref<256x32xf32, #tpu.memory_space<vmem>>, vector<256x32xf32>
    %cst = arith.constant 2.000000e+00 : f32
    %2 = vector.broadcast %cst : f32 to vector<128x32xf32>
    %3 = arith.mulf %0, %2 : vector<128x32xf32>
    %cst_3 = arith.constant dense<0.000000e+00> : vector<128x256xf32>
    %4 = tpu.matmul %3, %1, %cst_3 {dimension_numbers = #tpu.dot_dimension_numbers<[1], [1], [0], [0], [0, 0, 1, 0], [], []>} : vector<128x32xf32>, vector<256x32xf32>, vector<128x256xf32> -> vector<128x256xf32>
    %c0_4 = arith.constant 0 : index
    %c0_5 = arith.constant 0 : index
    %5 = vector.load %arg5[%c0_4, %c0_5] : memref<128x1xf32, #tpu.memory_space<vmem>>, vector<128x1xf32>
    %6 = vector.broadcast %5 : vector<128x1xf32> to vector<128x256xf32>
    %7 = arith.subf %4, %6 : vector<128x256xf32>
    %c0_6 = arith.constant 0 : index
    %c0_7 = arith.constant 0 : index
    %8 = vector.load %arg6[%c0_6, %c0_7] : memref<1x256xf32, #tpu.memory_space<vmem>>, vector<1x256xf32>
    %9 = vector.broadcast %8 : vector<1x256xf32> to vector<128x256xf32>
    %10 = arith.subf %7, %9 : vector<128x256xf32>
    %c0_8 = arith.constant 0 : index
    %11 = memref.load %arg2[%c0_8] : memref<3xf32, #tpu.memory_space<smem>>
    %12 = vector.broadcast %11 : f32 to vector<128x256xf32>
    %13 = arith.mulf %10, %12 : vector<128x256xf32>
    %14 = math.exp %13 : vector<128x256xf32>
    %c0_9 = arith.constant 0 : index
    %c0_10 = arith.constant 0 : index
    %c0_11 = arith.constant 0 : index
    %15 = vector.load %arg7[%c0_9, %c0_10, %c0_11] : memref<3x128x256xf32, #tpu.memory_space<vmem>>, vector<1x128x256xf32>
    %16 = vector.shape_cast %15 : vector<1x128x256xf32> to vector<128x256xf32>
    %17 = vector.shape_cast %14 : vector<128x256xf32> to vector<1x128x256xf32>
    tpu.vector_store %arg7[%c0_9, %c0_10, %c0_11], %17 {strides = array<i32>} : memref<3x128x256xf32, #tpu.memory_space<vmem>>, vector<1x128x256xf32>,
    %c1 = arith.constant 1 : index
    %18 = memref.load %arg2[%c1] : memref<3xf32, #tpu.memory_space<smem>>
    %19 = vector.broadcast %18 : f32 to vector<128x256xf32>
    %20 = arith.mulf %10, %19 : vector<128x256xf32>
    %21 = math.exp %20 : vector<128x256xf32>
    %c1_12 = arith.constant 1 : index
    %c0_13 = arith.constant 0 : index
    %c0_14 = arith.constant 0 : index
    %22 = vector.load %arg7[%c1_12, %c0_13, %c0_14] : memref<3x128x256xf32, #tpu.memory_space<vmem>>, vector<1x128x256xf32>
    %23 = vector.shape_cast %22 : vector<1x128x256xf32> to vector<128x256xf32>
    %24 = vector.shape_cast %21 : vector<128x256xf32> to vector<1x128x256xf32>
    tpu.vector_store %arg7[%c1_12, %c0_13, %c0_14], %24 {strides = array<i32>} : memref<3x128x256xf32, #tpu.memory_space<vmem>>, vector<1x128x256xf32>,
    %c2 = arith.constant 2 : index
    %25 = memref.load %arg2[%c2] : memref<3xf32, #tpu.memory_space<smem>>
    %26 = vector.broadcast %25 : f32 to vector<128x256xf32>
    %27 = arith.mulf %10, %26 : vector<128x256xf32>
    %28 = math.exp %27 : vector<128x256xf32>
    %c2_15 = arith.constant 2 : index
    %c0_16 = arith.constant 0 : index
    %c0_17 = arith.constant 0 : index
    %29 = vector.load %arg7[%c2_15, %c0_16, %c0_17] : memref<3x128x256xf32, #tpu.memory_space<vmem>>, vector<1x128x256xf32>
    %30 = vector.shape_cast %29 : vector<1x128x256xf32> to vector<128x256xf32>
    %31 = vector.shape_cast %28 : vector<128x256xf32> to vector<1x128x256xf32>
    tpu.vector_store %arg7[%c2_15, %c0_16, %c0_17], %31 {strides = array<i32>} : memref<3x128x256xf32, #tpu.memory_space<vmem>>, vector<1x128x256xf32>,
    return
  }
  func.func @transform_0(%arg0: i32, %arg1: i32) -> i32 {
    %c0_i32 = arith.constant 0 : i32
    %c0_i32_0 = arith.constant 0 : i32
    return %c0_i32 : i32
  }
  func.func @transform_1(%arg0: i32, %arg1: i32) -> (i32, i32) {
    %c0_i32 = arith.constant 0 : i32
    %c0_i32_0 = arith.constant 0 : i32
    return %arg0, %c0_i32 : i32, i32
  }
  func.func @transform_2(%arg0: i32, %arg1: i32) -> (i32, i32) {
    %c0_i32 = arith.constant 0 : i32
    %c0_i32_0 = arith.constant 0 : i32
    return %arg1, %c0_i32 : i32, i32
  }
  func.func @transform_3(%arg0: i32, %arg1: i32) -> (i32, i32) {
    %c0_i32 = arith.constant 0 : i32
    %c0_i32_0 = arith.constant 0 : i32
    return %arg0, %c0_i32 : i32, i32
  }
  func.func @transform_4(%arg0: i32, %arg1: i32) -> (i32, i32) {
    %c0_i32 = arith.constant 0 : i32
    %c0_i32_0 = arith.constant 0 : i32
    return %c0_i32, %arg1 : i32, i32
  }
  func.func @transform_5(%arg0: i32, %arg1: i32) -> (i32, i32, i32) {
    %c0_i32 = arith.constant 0 : i32
    %c0_i32_0 = arith.constant 0 : i32
    return %c0_i32, %arg0, %arg1 : i32, i32, i32
  }
}

</mosaic_0001>

<bundles_post_ra>
// kernel: tpu_custom_call.1
= control target key start
LH: loop header
LB: loop body
LE: loop exit
PB: predicated region body
PF: predicated region fallthrough
CT: control target
= control target key end

     0   :  { %s2871_s0 = inlined_call_operand.hbm [shape: f32[3], index: 0, kind: input, shape index: {}]   ;;  %s2872_s1 = inlined_call_operand.vmem [shape: f32[512,32], index: 1, kind: input, shape index: {}]   ;;  %s2873_s2 = inlined_call_operand.vmem [shape: f32[512,32], index: 2, kind: input, shape index: {}]   ;;  %s2874_s3 = inlined_call_operand.vmem [shape: f32[512,1], index: 3, kind: input, shape index: {}]   ;;  %s2875_s4 = inlined_call_operand.hbm [shape: f32[1,512], index: 4, kind: input, shape index: {}]   ;;  %s2876_s5 = inlined_call_operand.hbm [shape: f32[3,512,512], index: 5, kind: output, shape index: {}]  }
   0x1   :  { %2885 = sst [smem:[#allocation19_spill]] %s2871_s0 }
   0x2   :  { %2886 = sst [smem:[#allocation20_spill]] %s2876_s5 }
   0x3   :  { %10 = vsyncpa [#allocation5], 0 }
   0x4   :  { %11 = vsyncpa [#allocation3], 0 }
   0x5   :  { %13 = vsyncpa [#allocation3 + $0x1], 0 }
   0x6   :  { %14 = vsyncpa [#allocation4], 0 }
   0x7   :  { %16 = vsyncpa [#allocation4 + $0x1], 0  ;;  %s2181_s18 = smov 0   ;;  %s2183_s19 = smov 0  }
   0x8   :  { %s2185_s20 = smov 0   ;;  %s2187_s21 = smov 0  }
   0x9   :  { %s2189_s22 = smov 0   ;;  %s2191_s23 = smov 0  }
   0xa   :  { %s2193_s24 = smov 0   ;;  %s2195_s25 = smov 0  }
   0xb   :  { %s2197_s26 = smov 0   ;;  %s2199_s27 = smov 0  }
   0xc   :  { %s2201_s28 = smov 0  }
   0xd LB: > { %2887 = sst [smem:[#allocation13_spill]] %s2099_s18  ;;  %s1445_s29 = sadd.s32 4294967295, %s2139_s28   ;;  %s2139_s28 = sphi %s2201_s28, %s22_s28   ;;  %s2135_s27 = sphi %s2199_s27, %s2919_s27   ;;  %s2131_s26 = sphi %s2197_s26, %s2918_s26   ;;  %s2127_s25 = sphi %s2195_s25, %s2917_s25   ;;  %s2123_s24 = sphi %s2193_s24, %s2916_s24   ;;  %s2119_s23 = sphi %s2191_s23, %s2915_s23   ;;  %s2115_s22 = sphi %s2189_s22, %s2914_s22   ;;  %s2111_s21 = sphi %s2187_s21, %s2913_s21   ;;  %s2107_s20 = sphi %s2185_s20, %s2912_s20   ;;  %s2103_s19 = sphi %s2183_s19, %s2911_s19   ;;  %s2099_s18 = sphi %s2181_s18, %s2908_s18  }
   0xe   : > { %2888 = sst [smem:[#allocation14_spill]] %s2103_s19  ;;  %s1446_s30 = sadd.s32 4294967294, %s2139_s28  }
   0xf   : > { %p153_p0 = scmp.ne.s32.totalorder %s2115_s22, %s2111_s21  ;;  %p2237_p1 = scmp.eq.s32.totalorder %s1445_s29, 0 }
  0x10   : > { %p178_p2 = scmp.ne.s32.totalorder %s2107_s20, %s2103_s19  ;;  %p179_p3 = scmp.eq.s32.totalorder %s1445_s29, 7 }
  0x11   : > { %p2245_p4 = por %p2237_p1, %p153_p0  ;;  %p184_p5 = scmp.ne.s32.totalorder %s2103_s19, %s2099_s18 }
  0x12   : > { %p2251_p6 = por %p179_p3, %p178_p2  ;;  %p185_p7 = scmp.eq.s32.totalorder %s1446_s30, 7 }
  0x13   : > { %p1447_p8 = scmp.ge.s32.totalorder %s2139_s28, 1  ;;  %p192_p9 = scmp.lt.s32.totalorder %s2139_s28, 9 }
  0x14   : > { %s2891_s8 = scalar_select %p2251_p6, 1, 0 }
  0x15   : > { %p2257_p10 = por %p185_p7, %p184_p5  ;;  %p2261_p11 = pnand %p1447_p8, %p192_p9 }
  0x16   : > { %2892 = sst [smem:[#allocation15_spill]] %s2891_s8  ;;  %s31_s11 = sadd.s32 1, %s2131_s26 }
  0x17   : > { %s2893_s9 = scalar_select %p2257_p10, 1, 0 }
  0x18   : > { %p1695_p12 = pneg %p2261_p11  ;;  %p32_p0 = scmp.ge.s32.totalorder %s31_s11, 2 }
  0x19   : > { %2894 = sst [smem:[#allocation16_spill]] %s2893_s9  ;;  %s2141_s12 = smov [#allocation2]  }
  0x1a   : > { %p1696_p13 = pnand %p1695_p12, %p2237_p1  ;;  %s2896_s0 = sld [smem:[#allocation19_spill]] }
  0x1b   : > { %s2921_s11 = smov (%p32_p0, %s31_s11), 0  ;;  %s34_s15 = sadd.s32 1, %s2135_s27 }
  0x1c   : > { %2897 = sst [smem:[#allocation17_spill]] %s2921_s11  ;;  %s140_s16 = sadd.s32 1, %s2119_s23 }
  0x1d   : > { %s2923_s15 = smov (!%p32_p0, %s34_s15), %s2135_s27  ;;  %s137_s17 = ssub.s32 %s2131_s26, %s2921_s11 }
  0x1e   : > { %p147_p2 = scmp.ne.s32.totalorder %s2119_s23, %s2115_s22  ;;  %p36_p3 = scmp.ge.s32.totalorder %s2923_s15, 4 }
  0x1f   : > { %p138_p5 = scmp.eq.s32.totalorder %s137_s17, 0  ;;  %p148_p7 = scmp.eq.s32.totalorder %s2139_s28, 0 }
  0x20   : > { %1698 = dma.hbm_to_smem (!%p1696_p13), %s2896_s0, 16, %s2141_s12, [#allocation5]  }
  0x21   : > { %s168_s21 = sadd.s32 1, %s2107_s20  ;;  %s2925_s15 = smov (%p36_p3, %s2923_s15), 0 }
  0x22   : > { %s2287_s29 = scalar_select %p138_p5, %s2119_s23, %s140_s16  }
  0x23   : > { %p2289_p8 = por %p148_p7, %p147_p2  ;;  %s163_s12 = ssub.s32 %s2135_s27, %s2925_s15 }
  0x24   : > { %2898 = sst [smem:[#allocation18_spill]] %s2287_s29  ;;  %s165_s13 = sor.u32 %s163_s12, %s137_s17 }
  0x25   : > { %p1708_p9 = scmp.lt.s32.totalorder %s2139_s28, 8  ;;  %p166_p12 = scmp.eq.s32.totalorder %s165_s13, 0 }
  0x26   : > { %s241_s14 = sand.u32 1, %s2119_s23   ;;  %s1582_s9 = sshll.u32 %s2131_s26, 5 }
  0x27   : > { %s1450_s0 = sshll.u32 %s241_s14, 1  ;;  %s251_s8 = scalar_lea.hbm %s2875_s4, %s1582_s9 }
  0x28   : > { %s2298_s11 = scalar_select %p166_p12, %s2107_s20, %s168_s21  }
  0x29   : > { %s245_s16 = scalar_lea.vmem [#allocation6], %s1450_s0  ;;  %p2306_p13 = pnand %p1708_p9, %p2289_p8 }
  0x2a   : > { %s253_s29 = sshll.u32 %s245_s16, 4  ;;  %s242_s17 = scalar_lea.sflag [#allocation3], %s241_s14  ;;  %s254_s29 = int_to_ptr.vmem [resolvable:$true] %s253_s29 }
  0x2b   : > { %p2015_p0 = pneg %p2306_p13  ;;  %s2026_s12 = scalar_lea.vmem %s254_s29, 32 }
  0x2c   : > { %p2027_p2 = scmp.ne.s32.totalorder %s254_s29, %s2026_s12  ;;  %s2142_s21 = smov [#allocation6]  }
  0x2d   : > { %s2031_s13 = sshll.u32 %s2142_s21, 4  ;;  %s2032_s13 = int_to_ptr.vmem [resolvable:$false] %s2031_s13 }
  0x2e   : > { %p2029_p3 = pnand %p2027_p2, %p2015_p0  ;;  %s2033_s5 = scalar_lea.vmem %s2032_s13, 64 }
  0x2f   : > { %p2034_p7 = scmp.lt.s32.totalorder %s254_s29, %s2032_s13  ;;  %p2035_p12 = scmp.lt.s32.totalorder %s2033_s5, %s2026_s12 }
  0x30   : > { %p2030_p5 = pneg %p2029_p3 }
  0x31   : > { %p2036_p10 = por %p2035_p12, %p2034_p7 }
  0x33   : > { %p2037_p6 = pnand %p2036_p10, %p2030_p5 }
  0x35   : > { %2040 = shalt.err (!%p2037_p6)
}
  0x36   : > { %1702 = dma.hbm_to_vmem [thread:$0]  (!%p2306_p13), %s251_s8, 32, %s254_s29, %s242_s17  }
  0x37   : > { %262 = sbr.rel (%p2261_p11) target bundleno = 464 (0x1d0), region = 40 }
  0x3c   : > { %2086 = dma.done.wait (%p2237_p1), [#allocation5], 16  }
  0x3d   : > { %2088 = vsyncadd (%p2237_p1), [#allocation5], 4294967280  ;;  %s268_s0 = sand.u32 1, %s2115_s22  }
  0x3e   : > { %s2321_s18 = sshll.u32 %s268_s0, 1  ;;  %s269_s9 = scalar_lea.sflag [#allocation3], %s268_s0 }
  0x3f   : > { %s272_s30 = scalar_lea.vmem [#allocation6], %s2321_s18 }
  0x40   : > { %2090 = dma.done.wait (%p2245_p4), %s269_s9, 32  }
  0x41   : > { %2092 = vsyncadd (%p2245_p4), %s269_s9, 4294967264 }
  0x42   : > { %277 = sfence }
  0x43   : > { %s1458_s19 = sshll.u32 %s2123_s24, 5  ;;  %s1456_s8 = sshll.u32 %s2127_s25, 4  ;;  %v2143_v0 = vmov 0   ;;  %vm400_vm0 = vcmask 261120  }
  0x44   : > { %p322_p6 = scmp.lt.s32.totalorder %s1458_s19, 63  ;;  %1809 = vset.pattern.permute.xlu1 %v2143_v0  ;;  %1808 = vset.pattern.permute.xlu0 %v2143_v0  ;;  %p316_p1 = scmp.lt.s32.totalorder %s1456_s8, 63 }
  0x45   : > { %s2901_s0 = sld [smem:[#allocation14_spill]] }
  0x46   : > { %s2927_s19 = smov (!%p322_p6, %s1458_s19), 63  ;;  %s2929_s8 = smov (!%p316_p1, %s1456_s8), 63 }
  0x47   : > { %s1459_s6 = sshll.u32 %s2927_s19, 3  ;;  %s1457_s7 = sshll.u32 %s2929_s8, 3 }
  0x48   : > { %s2333_s14 = scalar_lea.vmem %s2873_s2, %s1459_s6  ;;  %s2357_s12 = scalar_lea.vmem %s2872_s1, %s1457_s7 }
  0x49   : > { %v383_v1 = vld [vmem:[%s2333_s14 + $0xf8] sm:$0xff]  ;;  %v382_v3 = vld [vmem:[%s2333_s14 + $0xf0] sm:$0xff]  ;;  %v381_v5 = vld [vmem:[%s2333_s14 + $0xe8] sm:$0xff]  ;;  %s2377_s5 = scalar_lea.vmem %s2874_s3, %s1457_s7  ;;  %s878_s19 = sld [smem:[#allocation2]] }
  0x4a   : > { %v367_v2 = vld [vmem:[%s2333_s14 + $0x78] sm:$0xff]  ;;  %1584 = vmatprep.subr.msk.mxu0 %vm400_vm0, %v383_v1  ;;  %1648 = vmatprep.subr.msk.mxu1 %vm400_vm0, %v383_v1  ;;  %v366_v4 = vld [vmem:[%s2333_s14 + $0x70] sm:$0xff]  ;;  %v365_v6 = vld [vmem:[%s2333_s14 + $0x68] sm:$0xff]  ;;  %s1510_s8 = sld [smem:[#allocation2 + $0x1]] }
  0x4b   : > { %1585 = vmatpush3.xpose.msk.msra.mxu0 %vm400_vm0, %v367_v2  ;;  %1664 = vmatpush3.xpose.msk.msra.mxu1 %vm400_vm0, %v367_v2  ;;  %v380_v7 = vld [vmem:[%s2333_s14 + $0xe0] sm:$0xff]  ;;  %v379_v12 = vld [vmem:[%s2333_s14 + $0xd8] sm:$0xff]  ;;  %v378_v15 = vld [vmem:[%s2333_s14 + $0xd0] sm:$0xff]  ;;  %s312_s9 = sand.u32 1, %s2901_s0   ;;  %s1543_s6 = sld [smem:[#allocation2 + $0x2]] }
  0x4c   : > { %1586 = vmatprep.subr.msk.mxu0 %vm400_vm0, %v382_v3  ;;  %1649 = vmatprep.subr.msk.mxu1 %vm400_vm0, %v382_v3  ;;  %v336_v8 = vld [vmem:[%s2357_s12] sm:$0xff]  ;;  %v363_v14 = vld [vmem:[%s2333_s14 + $0x58] sm:$0xff]  ;;  %v708_v16 = vld [vmem:[%s2377_s5 + $0x10] sm:$0xff]  ;;  %s2569_s18 = smul.u32 768, %s312_s9  ;;  %s1271_s10 = scalar_lea.sflag [#allocation4], %s312_s9 }
  0x4d   : > { %v364_v9 = vld [vmem:[%s2333_s14 + $0x60] sm:$0xff]  ;;  %v2366_v10 = vmul.f32 2.0, %v336_v8  ;;  %734 = vperm.xlu1 %1809, %v708_v16   ;;  %v709_v18 = vld [vmem:[%s2377_s5 + $0x18] sm:$0xff]  ;;  %v707_v19 = vld [vmem:[%s2377_s5 + $0x8] sm:$0xff] }
  0x4e   : > { %v344_v11 = vld [vmem:[%s2357_s12 + $0x40] sm:$0xff]  ;;  %v362_v20 = vld [vmem:[%s2333_s14 + $0x50] sm:$0xff]  ;;  %v377_v21 = vld [vmem:[%s2333_s14 + $0xc8] sm:$0xff] }
  0x4f   : > { %1587 = vmatpush3.xpose.msk.msra.mxu0 %vm400_vm0, %v366_v4  ;;  %1665 = vmatpush3.xpose.msk.msra.mxu1 %vm400_vm0, %v366_v4  ;;  %v2370_v13 = vmul.f32 2.0, %v344_v11  ;;  %v706_v17 = vld [vmem:[%s2377_s5] sm:$0xff]  ;;  %v711_v22 = vld [vmem:[%s2377_s5 + $0x28] sm:$0xff]  ;;  %v713_v26 = vld [vmem:[%s2377_s5 + $0x38] sm:$0xff] }
  0x50   : > { %1588 = vmatprep.subr.msk.mxu0 %vm400_vm0, %v381_v5  ;;  %1650 = vmatprep.subr.msk.mxu1 %vm400_vm0, %v381_v5  ;;  %v710_v23 = vld [vmem:[%s2377_s5 + $0x20] sm:$0xff]  ;;  %v361_v24 = vld [vmem:[%s2333_s14 + $0x48] sm:$0xff]  ;;  %v712_v27 = vld [vmem:[%s2377_s5 + $0x30] sm:$0xff] }
  0x51   : > { %1616 = vmatprep.mubr.msk.f32.mxu0 %vm400_vm0, %v2366_v10  ;;  %1632 = vmatprep.mubr.msk.f32.mxu1 %vm400_vm0, %v2370_v13  ;;  %v376_v25 = vld [vmem:[%s2333_s14 + $0xc0] sm:$0xff]  ;;  %v375_v29 = vld [vmem:[%s2333_s14 + $0xb8] sm:$0xff]  ;;  %v715_v30 = vld [vmem:[%s2377_s5 + $0x48] sm:$0xff] }
  0x52   : > { %724 = vperm.xlu0 %1808, %v706_v17   ;;  %739 = vperm.xlu1 %1809, %v709_v18   ;;  %v360_v28 = vld [vmem:[%s2333_s14 + $0x40] sm:$0xff]  ;;  %v359_v32 = vld [vmem:[%s2333_s14 + $0x38] sm:$0xff]  ;;  %v374_v33 = vld [vmem:[%s2333_s14 + $0xb0] sm:$0xff] }
  0x53   : > { %1589 = vmatpush3.xpose.msk.msra.mxu0 %vm400_vm0, %v365_v6  ;;  %1666 = vmatpush3.xpose.msk.msra.mxu1 %vm400_vm0, %v365_v6  ;;  %v714_v31 = vld [vmem:[%s2377_s5 + $0x40] sm:$0xff]  ;;  %v717_v34 = vld [vmem:[%s2377_s5 + $0x58] sm:$0xff]  ;;  %v716_v35 = vld [vmem:[%s2377_s5 + $0x50] sm:$0xff] }
  0x54   : > { %1590 = vmatprep.subr.msk.mxu0 %vm400_vm0, %v380_v7  ;;  %1651 = vmatprep.subr.msk.mxu1 %vm400_vm0, %v380_v7  ;;  %v358_v36 = vld [vmem:[%s2333_s14 + $0x30] sm:$0xff]  ;;  %v373_v37 = vld [vmem:[%s2333_s14 + $0xa8] sm:$0xff]  ;;  %v718_v39 = vld [vmem:[%s2377_s5 + $0x60] sm:$0xff] }
  0x55   : > { %v719_v38 = vld [vmem:[%s2377_s5 + $0x68] sm:$0xff]  ;;  %v372_v41 = vld [vmem:[%s2333_s14 + $0xa0] sm:$0xff]  ;;  %v721_v42 = vld [vmem:[%s2377_s5 + $0x78] sm:$0xff] }
  0x56   : > { %729 = vperm.xlu0 %1808, %v707_v19   ;;  %749 = vperm.xlu1 %1809, %v711_v22   ;;  %v357_v40 = vld [vmem:[%s2333_s14 + $0x28] sm:$0xff]  ;;  %v720_v43 = vld [vmem:[%s2377_s5 + $0x70] sm:$0xff]  ;;  %v356_v44 = vld [vmem:[%s2333_s14 + $0x20] sm:$0xff] }
  0x57   : > { %1591 = vmatpush3.xpose.msk.msra.mxu0 %vm400_vm0, %v364_v9  ;;  %1667 = vmatpush3.xpose.msk.msra.mxu1 %vm400_vm0, %v364_v9  ;;  %v371_v45 = vld [vmem:[%s2333_s14 + $0x98] sm:$0xff]  ;;  %v370_v47 = vld [vmem:[%s2333_s14 + $0x90] sm:$0xff]  ;;  %v369_v49 = vld [vmem:[%s2333_s14 + $0x88] sm:$0xff] }
  0x58   : > { %1592 = vmatprep.subr.msk.mxu0 %vm400_vm0, %v379_v12  ;;  %1652 = vmatprep.subr.msk.mxu1 %vm400_vm0, %v379_v12  ;;  %v355_v46 = vld [vmem:[%s2333_s14 + $0x18] sm:$0xff]  ;;  %v354_v48 = vld [vmem:[%s2333_s14 + $0x10] sm:$0xff]  ;;  %v353_v50 = vld [vmem:[%s2333_s14 + $0x8] sm:$0xff] }
  0x59   : > { %v368_v51 = vld [vmem:[%s2333_s14 + $0x80] sm:$0xff]  ;;  %v337_v53 = vld [vmem:[%s2357_s12 + $0x8] sm:$0xff]  ;;  %v338_v57 = vld [vmem:[%s2357_s12 + $0x10] sm:$0xff] }
  0x5a   : > { %744 = vperm.xlu0 %1808, %v710_v23   ;;  %759 = vperm.xlu1 %1809, %v713_v26   ;;  %v352_v52 = vld [vmem:[%s2333_s14] sm:$0xff]  ;;  %v345_v54 = vld [vmem:[%s2357_s12 + $0x48] sm:$0xff]  ;;  %v385_v55 = vmul.f32 2.0, %v337_v53  ;;  %v346_v58 = vld [vmem:[%s2357_s12 + $0x50] sm:$0xff]  ;;  %v386_v59 = vmul.f32 2.0, %v338_v57 }
  0x5b   : > { %1593 = vmatpush3.xpose.msk.msra.mxu0 %vm400_vm0, %v363_v14  ;;  %1668 = vmatpush3.xpose.msk.msra.mxu1 %vm400_vm0, %v363_v14  ;;  %v393_v56 = vmul.f32 2.0, %v345_v54  ;;  %v394_v60 = vmul.f32 2.0, %v346_v58  ;;  %v339_v61 = vld [vmem:[%s2357_s12 + $0x18] sm:$0xff]  ;;  %v340_v1 = vld [vmem:[%s2357_s12 + $0x20] sm:$0xff]  ;;  %v341_v5 = vld [vmem:[%s2357_s12 + $0x28] sm:$0xff] }
  0x5c   : > { %1594 = vmatprep.subr.msk.mxu0 %vm400_vm0, %v378_v15  ;;  %1653 = vmatprep.subr.msk.mxu1 %vm400_vm0, %v378_v15  ;;  %v347_v62 = vld [vmem:[%s2357_s12 + $0x58] sm:$0xff]  ;;  %v387_v63 = vmul.f32 2.0, %v339_v61  ;;  %v348_v2 = vld [vmem:[%s2357_s12 + $0x60] sm:$0xff]  ;;  %v388_v3 = vmul.f32 2.0, %v340_v1  ;;  %v349_v6 = vld [vmem:[%s2357_s12 + $0x68] sm:$0xff]  ;;  %v389_v7 = vmul.f32 2.0, %v341_v5 }
  0x5d   : > { %v395_v0 = vmul.f32 2.0, %v347_v62  ;;  %v396_v4 = vmul.f32 2.0, %v348_v2  ;;  %v397_v8 = vmul.f32 2.0, %v349_v6  ;;  %v342_v9 = vld [vmem:[%s2357_s12 + $0x30] sm:$0xff]  ;;  %v351_v14 = vld [vmem:[%s2357_s12 + $0x78] sm:$0xff] }
  0x5e   : > { %754 = vperm.xlu0 %1808, %v712_v27   ;;  %769 = vperm.xlu1 %1809, %v715_v30   ;;  %v390_v11 = vmul.f32 2.0, %v342_v9  ;;  %v399_v16 = vmul.f32 2.0, %v351_v14  ;;  %v834_v26 = vld [vmem:[%s272_s30] sm:$0x3]  ;;  %s2585_s30 = scalar_lea.vmem [#allocation7], %s2569_s18 }
  0x5f   : > { %1595 = vmatpush3.xpose.msk.msra.mxu0 %vm400_vm0, %v362_v20  ;;  %1669 = vmatpush3.xpose.msk.msra.mxu1 %vm400_vm0, %v362_v20 }
  0x60   : > { %1596 = vmatprep.subr.msk.mxu0 %vm400_vm0, %v377_v21  ;;  %1654 = vmatprep.subr.msk.mxu1 %vm400_vm0, %v377_v21  ;;  %v836_v21 = vlaneseq }
  0x62   : > { %764 = vperm.xlu0 %1808, %v714_v31   ;;  %779 = vperm.xlu1 %1809, %v717_v34   ;;  %v837_v22 = vshrl.u32 %v836_v21, 7 }
  0x63   : > { %1597 = vmatpush3.xpose.msk.msra.mxu0 %vm400_vm0, %v361_v24  ;;  %1670 = vmatpush3.xpose.msk.msra.mxu1 %vm400_vm0, %v361_v24 }
  0x64   : > { %1598 = vmatprep.subr.msk.mxu0 %vm400_vm0, %v376_v25  ;;  %1655 = vmatprep.subr.msk.mxu1 %vm400_vm0, %v376_v25  ;;  %v838_v25 = vsub.s32 0, %v837_v22  ;;  %v842_v27 = vsub.s32 1, %v837_v22 }
  0x66   : > { %774 = vperm.xlu0 %1808, %v716_v35   ;;  %789 = vperm.xlu1 %1809, %v719_v38   ;;  %v2531_v30 = vrot.slane %v834_v26, %v838_v25  ;;  %v2533_v35 = vstv %s878_s19 }
  0x67   : > { %1599 = vmatpush3.xpose.msk.msra.mxu0 %vm400_vm0, %v360_v28  ;;  %1671 = vmatpush3.xpose.msk.msra.mxu1 %vm400_vm0, %v360_v28 }
  0x68   : > { %1600 = vmatprep.subr.msk.mxu0 %vm400_vm0, %v375_v29  ;;  %1656 = vmatprep.subr.msk.mxu1 %vm400_vm0, %v375_v29 }
  0x6a   : > { %784 = vperm.xlu0 %1808, %v718_v39   ;;  %799 = vperm.xlu1 %1809, %v721_v42   ;;  %v2539_v39 = vrot.slane %v834_v26, %v842_v27 }
  0x6b   : > { %1601 = vmatpush3.xpose.msk.msra.mxu0 %vm400_vm0, %v359_v32  ;;  %1672 = vmatpush3.xpose.msk.msra.mxu1 %vm400_vm0, %v359_v32 }
  0x6c   : > { %1602 = vmatprep.subr.msk.mxu0 %vm400_vm0, %v374_v33  ;;  %1657 = vmatprep.subr.msk.mxu1 %vm400_vm0, %v374_v33 }
  0x6e   : > { %794 = vperm.xlu0 %1808, %v720_v43  }
  0x6f   : > { %1603 = vmatpush3.xpose.msk.msra.mxu0 %vm400_vm0, %v358_v36  ;;  %1673 = vmatpush3.xpose.msk.msra.mxu1 %vm400_vm0, %v358_v36  ;;  %v2535_v36 = vstv %s1510_s8 }
  0x70   : > { %1604 = vmatprep.subr.msk.mxu0 %vm400_vm0, %v373_v37  ;;  %1658 = vmatprep.subr.msk.mxu1 %vm400_vm0, %v373_v37  ;;  %v2537_v37 = vstv %s1543_s6 }
  0x73   : > { %1605 = vmatpush3.xpose.msk.msra.mxu0 %vm400_vm0, %v357_v40  ;;  %1674 = vmatpush3.xpose.msk.msra.mxu1 %vm400_vm0, %v357_v40 }
  0x74   : > { %1606 = vmatprep.subr.msk.mxu0 %vm400_vm0, %v372_v41  ;;  %1659 = vmatprep.subr.msk.mxu1 %vm400_vm0, %v372_v41 }
  0x77   : > { %1607 = vmatpush3.xpose.msk.msra.mxu0 %vm400_vm0, %v356_v44  ;;  %1675 = vmatpush3.xpose.msk.msra.mxu1 %vm400_vm0, %v356_v44 }
  0x78   : > { %1608 = vmatprep.subr.msk.mxu0 %vm400_vm0, %v371_v45  ;;  %1660 = vmatprep.subr.msk.mxu1 %vm400_vm0, %v371_v45 }
  0x7b   : > { %1609 = vmatpush3.xpose.msk.msra.mxu0 %vm400_vm0, %v355_v46  ;;  %1676 = vmatpush3.xpose.msk.msra.mxu1 %vm400_vm0, %v355_v46 }
  0x7c   : > { %1610 = vmatprep.subr.msk.mxu0 %vm400_vm0, %v370_v47  ;;  %1661 = vmatprep.subr.msk.mxu1 %vm400_vm0, %v370_v47 }
  0x7f   : > { %1611 = vmatpush3.xpose.msk.msra.mxu0 %vm400_vm0, %v354_v48  ;;  %1677 = vmatpush3.xpose.msk.msra.mxu1 %vm400_vm0, %v354_v48 }
  0x80   : > { %1612 = vmatprep.subr.msk.mxu0 %vm400_vm0, %v369_v49  ;;  %1662 = vmatprep.subr.msk.mxu1 %vm400_vm0, %v369_v49 }
  0x83   : > { %1613 = vmatpush3.xpose.msk.msra.mxu0 %vm400_vm0, %v353_v50  ;;  %1678 = vmatpush3.xpose.msk.msra.mxu1 %vm400_vm0, %v353_v50 }
  0x84   : > { %1614 = vmatprep.subr.msk.mxu0 %vm400_vm0, %v368_v51  ;;  %1663 = vmatprep.subr.msk.mxu1 %vm400_vm0, %v368_v51 }
  0x87   : > { %1615 = vmatpush3.xpose.msk.msra.mxu0 %vm400_vm0, %v352_v52  ;;  %1679 = vmatpush3.xpose.msk.msra.mxu1 %vm400_vm0, %v352_v52 }
  0x8a   : > { %1617 = vmatmul.mubr.msk.f32.vlgmr.msra.gmra.mxu0 %vm400_vm0, %v2366_v10  ;;  %1633 = vmatmul.mubr.msk.f32.vlgmr.msra.gmra.mxu1 %vm400_vm0, %v2370_v13  ;;  %v350_v10 = vld [vmem:[%s2357_s12 + $0x70] sm:$0xff]  ;;  %v343_v13 = vld [vmem:[%s2357_s12 + $0x38] sm:$0xff] }
  0x8b   : > { %1618 = vmatprep.mubr.msk.f32.mxu0 %vm400_vm0, %v385_v55  ;;  %1634 = vmatprep.mubr.msk.f32.mxu1 %vm400_vm0, %v393_v56  ;;  %v398_v12 = vmul.f32 2.0, %v350_v10  ;;  %v391_v15 = vmul.f32 2.0, %v343_v13 }
  0x8e   : > { %1619 = vmatmul.mubr.msk.f32.gmra.mxu0 %vm400_vm0, %v385_v55  ;;  %1635 = vmatmul.mubr.msk.f32.gmra.mxu1 %vm400_vm0, %v393_v56 }
  0x8f   : > { %1620 = vmatprep.mubr.msk.f32.mxu0 %vm400_vm0, %v386_v59  ;;  %1636 = vmatprep.mubr.msk.f32.mxu1 %vm400_vm0, %v394_v60 }
  0x92   : > { %1621 = vmatmul.mubr.msk.f32.gmra.mxu0 %vm400_vm0, %v386_v59  ;;  %1637 = vmatmul.mubr.msk.f32.gmra.mxu1 %vm400_vm0, %v394_v60 }
  0x93   : > { %1622 = vmatprep.mubr.msk.f32.mxu0 %vm400_vm0, %v387_v63  ;;  %1638 = vmatprep.mubr.msk.f32.mxu1 %vm400_vm0, %v395_v0 }
  0x96   : > { %1623 = vmatmul.mubr.msk.f32.gmra.mxu0 %vm400_vm0, %v387_v63  ;;  %1639 = vmatmul.mubr.msk.f32.gmra.mxu1 %vm400_vm0, %v395_v0 }
  0x97   : > { %1624 = vmatprep.mubr.msk.f32.mxu0 %vm400_vm0, %v388_v3  ;;  %1640 = vmatprep.mubr.msk.f32.mxu1 %vm400_vm0, %v396_v4 }
  0x9a   : > { %1625 = vmatmul.mubr.msk.f32.gmra.mxu0 %vm400_vm0, %v388_v3  ;;  %1641 = vmatmul.mubr.msk.f32.gmra.mxu1 %vm400_vm0, %v396_v4 }
  0x9b   : > { %1626 = vmatprep.mubr.msk.f32.mxu0 %vm400_vm0, %v389_v7  ;;  %1642 = vmatprep.mubr.msk.f32.mxu1 %vm400_vm0, %v397_v8 }
  0x9e   : > { %1627 = vmatmul.mubr.msk.f32.gmra.mxu0 %vm400_vm0, %v389_v7  ;;  %1643 = vmatmul.mubr.msk.f32.gmra.mxu1 %vm400_vm0, %v397_v8 }
  0x9f   : > { %1628 = vmatprep.mubr.msk.f32.mxu0 %vm400_vm0, %v390_v11  ;;  %1644 = vmatprep.mubr.msk.f32.mxu1 %vm400_vm0, %v398_v12 }
  0xa2   : > { %1629 = vmatmul.mubr.msk.f32.gmra.mxu0 %vm400_vm0, %v390_v11  ;;  %1645 = vmatmul.mubr.msk.f32.gmra.mxu1 %vm400_vm0, %v398_v12 }
  0xa3   : > { %1630 = vmatprep.mubr.msk.f32.mxu0 %vm400_vm0, %v391_v15  ;;  %1646 = vmatprep.mubr.msk.f32.mxu1 %vm400_vm0, %v399_v16 }
  0xa6   : > { %1631 = vmatmul.mubr.msk.f32.gmra.mxu0 %vm400_vm0, %v391_v15  ;;  %1647 = vmatmul.mubr.msk.f32.gmra.mxu1 %vm400_vm0, %v399_v16 }
  0xc8   : > { %v2519_v19 = vpop.permute.xlu1 %734 }
  0xcd   : > { %v725_v17 = vpop.permute.xlu0 %724  ;;  %v2523_v23 = vpop.permute.xlu1 %739 }
  0xd1   : > { %v2517_v18 = vpop.permute.xlu0 %729  ;;  %v2529_v28 = vpop.permute.xlu1 %749 }
  0xd5   : > { %v2521_v20 = vpop.permute.xlu0 %744  ;;  %v2547_v50 = vpop.permute.xlu1 %759 }
  0xd9   : > { %v2525_v24 = vpop.permute.xlu0 %754  ;;  %v770_v9 = vpop.permute.xlu1 %769 }
  0xdd   : > { %v765_v29 = vpop.permute.xlu0 %764 }
 0x14a   : > { %v611_v31 = vpop.f32.mrf.mxu0  ;;  %v659_v32 = vpop.f32.mrf.mxu1 }
 0x14b   : > { %v802_v33 = vsub.f32 %v611_v31, %v725_v17  ;;  %v818_v34 = vsub.f32 %v659_v32, %v765_v29 }
 0x14c   : > { %v613_v38 = vpop.f32.mrf.mxu0  ;;  %v661_v40 = vpop.f32.mrf.mxu1 }
 0x14d   : > { %v846_v41 = vsub.f32 %v802_v33, %v2531_v30  ;;  %v862_v42 = vsub.f32 %v818_v34, %v2531_v30  ;;  %v803_v43 = vsub.f32 %v613_v38, %v725_v17  ;;  %v819_v44 = vsub.f32 %v661_v40, %v765_v29 }
 0x14e   : > { %v617_v49 = vpop.f32.mrf.mxu0  ;;  %v665_v55 = vpop.f32.mrf.mxu1 }
 0x14f   : > { %v880_v45 = vmul.f32 %v2533_v35, %v846_v41  ;;  %v1010_v46 = vmul.f32 %v2535_v36, %v846_v41  ;;  %v1141_v47 = vmul.f32 %v2537_v37, %v846_v41  ;;  %v896_v48 = vmul.f32 %v2533_v35, %v862_v42 }
 0x150   : > { %v1026_v51 = vmul.f32 %v2535_v36, %v862_v42  ;;  %v1157_v52 = vmul.f32 %v2537_v37, %v862_v42  ;;  %v847_v53 = vsub.f32 %v803_v43, %v2539_v39  ;;  %v863_v54 = vsub.f32 %v819_v44, %v2539_v39  ;;  %v619_v4 = vpop.f32.mrf.mxu0  ;;  %v667_v5 = vpop.f32.mrf.mxu1 }
 0x151   : > { %v912_v56 = vmul.f32 1.442695, %v880_v45  ;;  %v1042_v57 = vmul.f32 1.442695, %v1010_v46  ;;  %v1173_v58 = vmul.f32 1.442695, %v1141_v47  ;;  %v804_v62 = vsub.f32 %v617_v49, %v2517_v18  ;;  %v2578_v47 = vpop.permute.xlu0 %774 }
 0x152   : > { %v944_v59 = vmul.f32 1.442695, %v896_v48  ;;  %v1074_v60 = vmul.f32 1.442695, %v1026_v51  ;;  %v881_v61 = vmul.f32 %v2533_v35, %v847_v53  ;;  %v1011_v63 = vmul.f32 %v2535_v36, %v847_v53  ;;  %v623_v31 = vpop.f32.mrf.mxu0  ;;  %v671_v43 = vpop.f32.mrf.mxu1 }
 0x153   : > { %1810 = vpow2.f32 %v912_v56  ;;  %v1142_v0 = vmul.f32 %v2537_v37, %v847_v53  ;;  %v897_v1 = vmul.f32 %v2533_v35, %v863_v54  ;;  %v1205_v2 = vmul.f32 1.442695, %v1157_v52 }
 0x154   : > { %1812 = vpow2.f32 %v1042_v57  ;;  %v1027_v3 = vmul.f32 %v2535_v36, %v863_v54  ;;  %v914_v6 = vmul.f32 1.442695, %v881_v61  ;;  %v1044_v7 = vmul.f32 1.442695, %v1011_v63  ;;  %v625_v46 = vpop.f32.mrf.mxu0 }
 0x155   : > { %1814 = vpow2.f32 %v1173_v58  ;;  %v1158_v8 = vmul.f32 %v2537_v37, %v863_v54  ;;  %v1175_v10 = vmul.f32 1.442695, %v1142_v0  ;;  %v946_v11 = vmul.f32 1.442695, %v897_v1  ;;  %v673_v0 = vpop.f32.mrf.mxu1 }
 0x156   : > { %1816 = vpow2.f32 %v944_v59  ;;  %v848_v12 = vsub.f32 %v804_v62, %v2531_v30  ;;  %v820_v13 = vsub.f32 %v665_v55, %v770_v9  ;;  %v805_v14 = vsub.f32 %v619_v4, %v2517_v18 }
 0x157   : > { %1818 = vpow2.f32 %v1074_v60  ;;  %v821_v15 = vsub.f32 %v667_v5, %v770_v9  ;;  %v1076_v16 = vmul.f32 1.442695, %v1027_v3  ;;  %v1207_v27 = vmul.f32 1.442695, %v1158_v8 }
 0x158   : > { %1820 = vpow2.f32 %v1205_v2  ;;  %v882_v17 = vmul.f32 %v2533_v35, %v848_v12  ;;  %v1012_v21 = vmul.f32 %v2535_v36, %v848_v12  ;;  %v1143_v22 = vmul.f32 %v2537_v37, %v848_v12 }
 0x159   : > { %1822 = vpow2.f32 %v914_v6  ;;  %v864_v25 = vsub.f32 %v820_v13, %v2531_v30  ;;  %v849_v26 = vsub.f32 %v805_v14, %v2539_v39  ;;  %v865_v29 = vsub.f32 %v821_v15, %v2539_v39 }
 0x15a   : > { %1824 = vpow2.f32 %v1044_v7  ;;  %v916_v18 = vmul.f32 1.442695, %v882_v17  ;;  %v1046_v38 = vmul.f32 1.442695, %v1012_v21  ;;  %v1177_v40 = vmul.f32 1.442695, %v1143_v22  ;;  %v629_v7 = vpop.f32.mrf.mxu0  ;;  %v677_v22 = vpop.f32.mrf.mxu1 }
 0x15b   : > { %1826 = vpow2.f32 %v1175_v10  ;;  %v898_v32 = vmul.f32 %v2533_v35, %v864_v25  ;;  %v1028_v33 = vmul.f32 %v2535_v36, %v864_v25  ;;  %v1159_v34 = vmul.f32 %v2537_v37, %v864_v25 }
 0x15c   : > { %1828 = vpow2.f32 %v946_v11  ;;  %v883_v41 = vmul.f32 %v2533_v35, %v849_v26  ;;  %v1013_v42 = vmul.f32 %v2535_v36, %v849_v26  ;;  %v1144_v45 = vmul.f32 %v2537_v37, %v849_v26 }
 0x15d   : > { %1830 = vpow2.f32 %v1076_v16  ;;  %v948_v44 = vmul.f32 1.442695, %v898_v32  ;;  %v1078_v48 = vmul.f32 1.442695, %v1028_v33  ;;  %v1209_v49 = vmul.f32 1.442695, %v1159_v34 }
 0x15e   : > { %1832 = vpow2.f32 %v1207_v27  ;;  %v899_v51 = vmul.f32 %v2533_v35, %v865_v29  ;;  %v1029_v53 = vmul.f32 %v2535_v36, %v865_v29  ;;  %v806_v54 = vsub.f32 %v623_v31, %v2519_v19 }
 0x15f   : > { %1834 = vpow2.f32 %v916_v18  ;;  %v822_v55 = vsub.f32 %v671_v43, %v2578_v47  ;;  %v918_v57 = vmul.f32 1.442695, %v883_v41  ;;  %v1048_v58 = vmul.f32 1.442695, %v1013_v42 }
 0x160   : > { %v1811_v52 = vpop.eup %1810  ;;  %1836 = vpow2.f32 %v1046_v38  ;;  %v807_v59 = vsub.f32 %v625_v46, %v2519_v19  ;;  %v1160_v61 = vmul.f32 %v2537_v37, %v865_v29  ;;  %v850_v62 = vsub.f32 %v806_v54, %v2531_v30  ;;  %v2608_v29 = vpop.permute.xlu1 %779 }
 0x161   : > { %v1813_v56 = vpop.eup %1812  ;;  %976 = vst [vmem:[%s2585_s30] sm:$0xff] %v1811_v52  ;;  %1838 = vpow2.f32 %v1177_v40  ;;  %v866_v63 = vsub.f32 %v822_v55, %v2531_v30  ;;  %v1179_v2 = vmul.f32 1.442695, %v1144_v45  ;;  %v950_v3 = vmul.f32 1.442695, %v899_v51  ;;  %v679_v54 = vpop.f32.mrf.mxu1 }
 0x162   : > { %v1815_v60 = vpop.eup %1814  ;;  %1511 = vst [vmem:[%s2585_s30 + $0x100] sm:$0xff] %v1813_v56  ;;  %1840 = vpow2.f32 %v948_v44  ;;  %v1080_v19 = vmul.f32 1.442695, %v1029_v53  ;;  %v884_v5 = vmul.f32 %v2533_v35, %v850_v62  ;;  %v1014_v6 = vmul.f32 %v2535_v36, %v850_v62 }
 0x163   : > { %v1817_v1 = vpop.eup %1816  ;;  %1544 = vst [vmem:[%s2585_s30 + $0x200] sm:$0xff] %v1815_v60  ;;  %1842 = vpow2.f32 %v1078_v48  ;;  %v1145_v9 = vmul.f32 %v2537_v37, %v850_v62  ;;  %v851_v10 = vsub.f32 %v807_v59, %v2539_v39  ;;  %v823_v11 = vsub.f32 %v673_v0, %v2578_v47 }
 0x164   : > { %v1819_v4 = vpop.eup %1818  ;;  %992 = vst [vmem:[%s2585_s30 + $0x80] sm:$0xff] %v1817_v1  ;;  %1844 = vpow2.f32 %v1209_v49  ;;  %v1211_v13 = vmul.f32 1.442695, %v1160_v61  ;;  %v900_v14 = vmul.f32 %v2533_v35, %v866_v63  ;;  %v920_v16 = vmul.f32 1.442695, %v884_v5  ;;  %v631_v49 = vpop.f32.mrf.mxu0 }
 0x165   : > { %v1821_v8 = vpop.eup %1820  ;;  %1527 = vst [vmem:[%s2585_s30 + $0x180] sm:$0xff] %v1819_v4  ;;  %1846 = vpow2.f32 %v918_v57  ;;  %v1030_v17 = vmul.f32 %v2535_v36, %v866_v63  ;;  %v808_v21 = vsub.f32 %v629_v7, %v2523_v23  ;;  %v1050_v26 = vmul.f32 1.442695, %v1014_v6 }
 0x166   : > { %v1823_v12 = vpop.eup %1822  ;;  %1560 = vst [vmem:[%s2585_s30 + $0x280] sm:$0xff] %v1821_v8  ;;  %1848 = vpow2.f32 %v1048_v58  ;;  %v1161_v27 = vmul.f32 %v2537_v37, %v866_v63  ;;  %v1181_v31 = vmul.f32 1.442695, %v1145_v9  ;;  %v885_v32 = vmul.f32 %v2533_v35, %v851_v10 }
 0x167   : > { %v1825_v15 = vpop.eup %1824  ;;  %977 = vst [vmem:[%s2585_s30 + $0x8] sm:$0xff] %v1823_v12  ;;  %1850 = vpow2.f32 %v1179_v2  ;;  %v867_v33 = vsub.f32 %v823_v11, %v2539_v39  ;;  %v952_v38 = vmul.f32 1.442695, %v900_v14  ;;  %v1015_v40 = vmul.f32 %v2535_v36, %v851_v10 }
 0x168   : > { %v1827_v25 = vpop.eup %1826  ;;  %1512 = vst [vmem:[%s2585_s30 + $0x108] sm:$0xff] %v1825_v15  ;;  %1852 = vpow2.f32 %v950_v3  ;;  %v824_v41 = vsub.f32 %v677_v22, %v2608_v29  ;;  %v1082_v43 = vmul.f32 1.442695, %v1030_v17  ;;  %v1146_v44 = vmul.f32 %v2537_v37, %v851_v10  ;;  %v635_v3 = vpop.f32.mrf.mxu0 }
 0x169   : > { %v1829_v18 = vpop.eup %1828  ;;  %1545 = vst [vmem:[%s2585_s30 + $0x208] sm:$0xff] %v1827_v25  ;;  %1854 = vpow2.f32 %v1080_v19  ;;  %v852_v45 = vsub.f32 %v808_v21, %v2531_v30  ;;  %v1213_v47 = vmul.f32 1.442695, %v1161_v27  ;;  %v901_v48 = vmul.f32 %v2533_v35, %v867_v33  ;;  %v2643_v22 = vpop.permute.xlu0 %784 }
 0x16a   : > { %v1831_v34 = vpop.eup %1830  ;;  %993 = vst [vmem:[%s2585_s30 + $0x88] sm:$0xff] %v1829_v18  ;;  %1856 = vpow2.f32 %v1211_v13  ;;  %v922_v52 = vmul.f32 1.442695, %v885_v32  ;;  %v1031_v53 = vmul.f32 %v2535_v36, %v867_v33  ;;  %v1052_v56 = vmul.f32 1.442695, %v1015_v40  ;;  %v683_v13 = vpop.f32.mrf.mxu1 }
 0x16b   : > { %v1833_v42 = vpop.eup %1832  ;;  %1528 = vst [vmem:[%s2585_s30 + $0x188] sm:$0xff] %v1831_v34  ;;  %1858 = vpow2.f32 %v920_v16  ;;  %v1162_v57 = vmul.f32 %v2537_v37, %v867_v33  ;;  %v868_v58 = vsub.f32 %v824_v41, %v2531_v30  ;;  %v1183_v60 = vmul.f32 1.442695, %v1146_v44  ;;  %v637_v32 = vpop.f32.mrf.mxu0 }
 0x16c   : > { %v1835_v46 = vpop.eup %1834  ;;  %1561 = vst [vmem:[%s2585_s30 + $0x288] sm:$0xff] %v1833_v42  ;;  %1860 = vpow2.f32 %v1050_v26  ;;  %v886_v61 = vmul.f32 %v2533_v35, %v852_v45  ;;  %v1016_v62 = vmul.f32 %v2535_v36, %v852_v45  ;;  %v954_v0 = vmul.f32 1.442695, %v901_v48  ;;  %v685_v44 = vpop.f32.mrf.mxu1 }
 0x16d   : > { %v1837_v51 = vpop.eup %1836  ;;  %978 = vst [vmem:[%s2585_s30 + $0x10] sm:$0xff] %v1835_v46  ;;  %1862 = vpow2.f32 %v1181_v31  ;;  %v809_v1 = vsub.f32 %v631_v49, %v2523_v23  ;;  %v825_v2 = vsub.f32 %v679_v54, %v2608_v29  ;;  %v1084_v19 = vmul.f32 1.442695, %v1031_v53 }
 0x16e   : > { %v1839_v55 = vpop.eup %1838  ;;  %1513 = vst [vmem:[%s2585_s30 + $0x110] sm:$0xff] %v1837_v51  ;;  %1864 = vpow2.f32 %v952_v38  ;;  %v1147_v5 = vmul.f32 %v2537_v37, %v852_v45  ;;  %v1215_v7 = vmul.f32 1.442695, %v1162_v57  ;;  %v902_v8 = vmul.f32 %v2533_v35, %v868_v58 }
 0x16f   : > { %v1841_v59 = vpop.eup %1840  ;;  %1546 = vst [vmem:[%s2585_s30 + $0x210] sm:$0xff] %v1839_v55  ;;  %1866 = vpow2.f32 %v1082_v43  ;;  %v853_v9 = vsub.f32 %v809_v1, %v2539_v39  ;;  %v924_v10 = vmul.f32 1.442695, %v886_v61  ;;  %v1032_v11 = vmul.f32 %v2535_v36, %v868_v58 }
 0x170   : > { %v1843_v63 = vpop.eup %1842  ;;  %994 = vst [vmem:[%s2585_s30 + $0x90] sm:$0xff] %v1841_v59  ;;  %1868 = vpow2.f32 %v1213_v47  ;;  %v810_v12 = vsub.f32 %v635_v3, %v2521_v20  ;;  %v1054_v15 = vmul.f32 1.442695, %v1016_v62  ;;  %v1163_v16 = vmul.f32 %v2537_v37, %v868_v58 }
 0x171   : > { %v1845_v4 = vpop.eup %1844  ;;  %1529 = vst [vmem:[%s2585_s30 + $0x190] sm:$0xff] %v1843_v63  ;;  %1870 = vpow2.f32 %v922_v52  ;;  %v869_v17 = vsub.f32 %v825_v2, %v2539_v39  ;;  %v1185_v25 = vmul.f32 1.442695, %v1147_v5  ;;  %v887_v26 = vmul.f32 %v2533_v35, %v853_v9 }
 0x172   : > { %v1847_v6 = vpop.eup %1846  ;;  %1562 = vst [vmem:[%s2585_s30 + $0x290] sm:$0xff] %v1845_v4  ;;  %1872 = vpow2.f32 %v1052_v56  ;;  %v956_v18 = vmul.f32 1.442695, %v902_v8  ;;  %v1017_v29 = vmul.f32 %v2535_v36, %v853_v9  ;;  %v826_v31 = vsub.f32 %v683_v13, %v2643_v22 }
 0x173   : > { %v1849_v23 = vpop.eup %1848  ;;  %979 = vst [vmem:[%s2585_s30 + $0x18] sm:$0xff] %v1847_v6  ;;  %1874 = vpow2.f32 %v1183_v60  ;;  %v1086_v34 = vmul.f32 1.442695, %v1032_v11  ;;  %v1148_v38 = vmul.f32 %v2537_v37, %v853_v9  ;;  %v854_v40 = vsub.f32 %v810_v12, %v2531_v30  ;;  %v2677_v12 = vpop.permute.xlu1 %789 }
 0x174   : > { %v1851_v14 = vpop.eup %1850  ;;  %1514 = vst [vmem:[%s2585_s30 + $0x118] sm:$0xff] %v1849_v23  ;;  %1876 = vpow2.f32 %v954_v0  ;;  %v1217_v42 = vmul.f32 1.442695, %v1163_v16  ;;  %v903_v43 = vmul.f32 %v2533_v35, %v869_v17  ;;  %v926_v46 = vmul.f32 1.442695, %v887_v26  ;;  %v641_v0 = vpop.f32.mrf.mxu0 }
 0x175   : > { %v1853_v21 = vpop.eup %1852  ;;  %1547 = vst [vmem:[%s2585_s30 + $0x218] sm:$0xff] %v1851_v14  ;;  %1878 = vpow2.f32 %v1084_v19  ;;  %v1033_v47 = vmul.f32 %v2535_v36, %v869_v17  ;;  %v811_v48 = vsub.f32 %v637_v32, %v2521_v20  ;;  %v1056_v51 = vmul.f32 1.442695, %v1017_v29 }
 0x176   : > { %v1855_v27 = vpop.eup %1854  ;;  %995 = vst [vmem:[%s2585_s30 + $0x98] sm:$0xff] %v1853_v21  ;;  %1880 = vpow2.f32 %v1215_v7  ;;  %v1164_v52 = vmul.f32 %v2537_v37, %v869_v17  ;;  %v870_v53 = vsub.f32 %v826_v31, %v2531_v30  ;;  %v1187_v55 = vmul.f32 1.442695, %v1148_v38  ;;  %v689_v7 = vpop.f32.mrf.mxu1 }
 0x177   : > { %v1857_v33 = vpop.eup %1856  ;;  %1530 = vst [vmem:[%s2585_s30 + $0x198] sm:$0xff] %v1855_v27  ;;  %1882 = vpow2.f32 %v924_v10  ;;  %v888_v56 = vmul.f32 %v2533_v35, %v854_v40  ;;  %v827_v57 = vsub.f32 %v685_v44, %v2643_v22  ;;  %v958_v20 = vmul.f32 1.442695, %v903_v43  ;;  %v643_v22 = vpop.f32.mrf.mxu0 }
 0x178   : > { %v1859_v41 = vpop.eup %1858  ;;  %1563 = vst [vmem:[%s2585_s30 + $0x298] sm:$0xff] %v1857_v33  ;;  %1884 = vpow2.f32 %v1054_v15  ;;  %v1018_v59 = vmul.f32 %v2535_v36, %v854_v40  ;;  %v1088_v61 = vmul.f32 1.442695, %v1033_v47  ;;  %v1149_v62 = vmul.f32 %v2537_v37, %v854_v40 }
 0x179   : > { %v1861_v45 = vpop.eup %1860  ;;  %980 = vst [vmem:[%s2585_s30 + $0x20] sm:$0xff] %v1859_v41  ;;  %1886 = vpow2.f32 %v1185_v25  ;;  %v855_v63 = vsub.f32 %v811_v48, %v2539_v39  ;;  %v1219_v2 = vmul.f32 1.442695, %v1164_v52  ;;  %v904_v3 = vmul.f32 %v2533_v35, %v870_v53  ;;  %v691_v41 = vpop.f32.mrf.mxu1 }
 0x17a   : > { %v1863_v49 = vpop.eup %1862  ;;  %1515 = vst [vmem:[%s2585_s30 + $0x120] sm:$0xff] %v1861_v45  ;;  %1888 = vpow2.f32 %v956_v18  ;;  %v928_v19 = vmul.f32 1.442695, %v888_v56  ;;  %v1034_v5 = vmul.f32 %v2535_v36, %v870_v53  ;;  %v871_v6 = vsub.f32 %v827_v57, %v2539_v39 }
 0x17b   : > { %v1865_v54 = vpop.eup %1864  ;;  %1548 = vst [vmem:[%s2585_s30 + $0x220] sm:$0xff] %v1863_v49  ;;  %1890 = vpow2.f32 %v1086_v34  ;;  %v1058_v9 = vmul.f32 1.442695, %v1018_v59  ;;  %v1165_v23 = vmul.f32 %v2537_v37, %v870_v53  ;;  %v812_v10 = vsub.f32 %v641_v0, %v2529_v28  ;;  %v647_v53 = vpop.f32.mrf.mxu0 }
 0x17c   : > { %v1867_v58 = vpop.eup %1866  ;;  %996 = vst [vmem:[%s2585_s30 + $0xa0] sm:$0xff] %v1865_v54  ;;  %1892 = vpow2.f32 %v1217_v42  ;;  %v1189_v13 = vmul.f32 1.442695, %v1149_v62  ;;  %v889_v14 = vmul.f32 %v2533_v35, %v855_v63  ;;  %v960_v16 = vmul.f32 1.442695, %v904_v3  ;;  %v695_v0 = vpop.f32.mrf.mxu1 }
 0x17d   : > { %v1869_v60 = vpop.eup %1868  ;;  %1531 = vst [vmem:[%s2585_s30 + $0x1a0] sm:$0xff] %v1867_v58  ;;  %1894 = vpow2.f32 %v926_v46  ;;  %v1019_v17 = vmul.f32 %v2535_v36, %v855_v63  ;;  %v828_v21 = vsub.f32 %v689_v7, %v2677_v12  ;;  %v1090_v26 = vmul.f32 1.442695, %v1034_v5  ;;  %v2711_v5 = vpop.permute.xlu0 %794 }
 0x17e   : > { %v1871_v1 = vpop.eup %1870  ;;  %1564 = vst [vmem:[%s2585_s30 + $0x2a0] sm:$0xff] %v1869_v60  ;;  %1896 = vpow2.f32 %v1056_v51  ;;  %v1150_v27 = vmul.f32 %v2537_v37, %v855_v63  ;;  %v856_v18 = vsub.f32 %v812_v10, %v2531_v30  ;;  %v1221_v31 = vmul.f32 1.442695, %v1165_v23 }
 0x17f   : > { %v1873_v4 = vpop.eup %1872  ;;  %981 = vst [vmem:[%s2585_s30 + $0x28] sm:$0xff] %v1871_v1  ;;  %1898 = vpow2.f32 %v1187_v55  ;;  %v905_v32 = vmul.f32 %v2533_v35, %v871_v6  ;;  %v930_v34 = vmul.f32 1.442695, %v889_v14  ;;  %v1035_v38 = vmul.f32 %v2535_v36, %v871_v6 }
 0x180   : > { %v1875_v8 = vpop.eup %1874  ;;  %1516 = vst [vmem:[%s2585_s30 + $0x128] sm:$0xff] %v1873_v4  ;;  %1900 = vpow2.f32 %v958_v20  ;;  %v813_v40 = vsub.f32 %v643_v22, %v2529_v28  ;;  %v1060_v43 = vmul.f32 1.442695, %v1019_v17  ;;  %v1166_v44 = vmul.f32 %v2537_v37, %v871_v6 }
 0x181   : > { %v1877_v11 = vpop.eup %1876  ;;  %1549 = vst [vmem:[%s2585_s30 + $0x228] sm:$0xff] %v1875_v8  ;;  %1902 = vpow2.f32 %v1088_v61  ;;  %v872_v45 = vsub.f32 %v828_v21, %v2531_v30  ;;  %v1191_v47 = vmul.f32 1.442695, %v1150_v27  ;;  %v890_v48 = vmul.f32 %v2533_v35, %v856_v18 }
 0x182   : > { %v1879_v15 = vpop.eup %1878  ;;  %997 = vst [vmem:[%s2585_s30 + $0xa8] sm:$0xff] %v1877_v11  ;;  %1904 = vpow2.f32 %v1219_v2  ;;  %v962_v28 = vmul.f32 1.442695, %v905_v32  ;;  %v1020_v51 = vmul.f32 %v2535_v36, %v856_v18  ;;  %v829_v52 = vsub.f32 %v691_v41, %v2677_v12  ;;  %v649_v11 = vpop.f32.mrf.mxu0 }
 0x183   : > { %v1881_v25 = vpop.eup %1880  ;;  %1532 = vst [vmem:[%s2585_s30 + $0x1a8] sm:$0xff] %v1879_v15  ;;  %1906 = vpow2.f32 %v928_v19  ;;  %v1092_v55 = vmul.f32 1.442695, %v1035_v38  ;;  %v1151_v56 = vmul.f32 %v2537_v37, %v856_v18  ;;  %v857_v57 = vsub.f32 %v813_v40, %v2539_v39  ;;  %v697_v18 = vpop.f32.mrf.mxu1 }
 0x184   : > { %v1883_v29 = vpop.eup %1882  ;;  %1565 = vst [vmem:[%s2585_s30 + $0x2a8] sm:$0xff] %v1881_v25  ;;  %1908 = vpow2.f32 %v1058_v9  ;;  %v1223_v20 = vmul.f32 1.442695, %v1166_v44  ;;  %v906_v59 = vmul.f32 %v2533_v35, %v872_v45  ;;  %v932_v61 = vmul.f32 1.442695, %v890_v48  ;;  %v653_v44 = vpop.f32.mrf.mxu0 }
 0x185   : > { %v1885_v33 = vpop.eup %1884  ;;  %982 = vst [vmem:[%s2585_s30 + $0x30] sm:$0xff] %v1883_v29  ;;  %1910 = vpow2.f32 %v1189_v13  ;;  %v1036_v62 = vmul.f32 %v2535_v36, %v872_v45  ;;  %v814_v63 = vsub.f32 %v647_v53, %v2525_v24  ;;  %v1062_v2 = vmul.f32 1.442695, %v1020_v51 }
 0x186   : > { %v1887_v42 = vpop.eup %1886  ;;  %1517 = vst [vmem:[%s2585_s30 + $0x130] sm:$0xff] %v1885_v33  ;;  %1912 = vpow2.f32 %v960_v16  ;;  %v1167_v3 = vmul.f32 %v2537_v37, %v872_v45  ;;  %v873_v4 = vsub.f32 %v829_v52, %v2539_v39  ;;  %v1193_v6 = vmul.f32 1.442695, %v1151_v56  ;;  %v701_v56 = vpop.f32.mrf.mxu1 }
 0x187   : > { %v1889_v46 = vpop.eup %1888  ;;  %1550 = vst [vmem:[%s2585_s30 + $0x230] sm:$0xff] %v1887_v42  ;;  %1914 = vpow2.f32 %v1090_v26  ;;  %v891_v7 = vmul.f32 %v2533_v35, %v857_v57  ;;  %v964_v9 = vmul.f32 1.442695, %v906_v59  ;;  %v1021_v23 = vmul.f32 %v2535_v36, %v857_v57 }
 0x188   : > { %v1891_v49 = vpop.eup %1890  ;;  %998 = vst [vmem:[%s2585_s30 + $0xb0] sm:$0xff] %v1889_v46  ;;  %1916 = vpow2.f32 %v1221_v31  ;;  %v830_v10 = vsub.f32 %v695_v0, %v2711_v5  ;;  %v1094_v13 = vmul.f32 1.442695, %v1036_v62  ;;  %v1152_v14 = vmul.f32 %v2537_v37, %v857_v57 }
 0x189   : > { %v1893_v54 = vpop.eup %1892  ;;  %1533 = vst [vmem:[%s2585_s30 + $0x1b0] sm:$0xff] %v1891_v49  ;;  %1918 = vpow2.f32 %v930_v34  ;;  %v858_v15 = vsub.f32 %v814_v63, %v2531_v30  ;;  %v1225_v17 = vmul.f32 1.442695, %v1167_v3  ;;  %v907_v21 = vmul.f32 %v2533_v35, %v873_v4 }
 0x18a   : > { %v1895_v58 = vpop.eup %1894  ;;  %1566 = vst [vmem:[%s2585_s30 + $0x2b0] sm:$0xff] %v1893_v54  ;;  %1920 = vpow2.f32 %v1060_v43  ;;  %v934_v25 = vmul.f32 1.442695, %v891_v7  ;;  %v1037_v26 = vmul.f32 %v2535_v36, %v873_v4  ;;  %v815_v27 = vsub.f32 %v649_v11, %v2525_v24 }
 0x18b   : > { %v1897_v60 = vpop.eup %1896  ;;  %983 = vst [vmem:[%s2585_s30 + $0x38] sm:$0xff] %v1895_v58  ;;  %1922 = vpow2.f32 %v1191_v47  ;;  %v1064_v31 = vmul.f32 1.442695, %v1021_v23  ;;  %v1168_v32 = vmul.f32 %v2537_v37, %v873_v4  ;;  %v874_v33 = vsub.f32 %v830_v10, %v2531_v30  ;;  %v655_v4 = vpop.f32.mrf.mxu0 }
 0x18c   : > { %v1899_v1 = vpop.eup %1898  ;;  %1518 = vst [vmem:[%s2585_s30 + $0x138] sm:$0xff] %v1897_v60  ;;  %1924 = vpow2.f32 %v962_v28  ;;  %v1195_v38 = vmul.f32 1.442695, %v1152_v14  ;;  %v892_v40 = vmul.f32 %v2533_v35, %v858_v15  ;;  %v966_v24 = vmul.f32 1.442695, %v907_v21  ;;  %v703_v14 = vpop.f32.mrf.mxu1 }
 0x18d   : > { %v1901_v19 = vpop.eup %1900  ;;  %1551 = vst [vmem:[%s2585_s30 + $0x238] sm:$0xff] %v1899_v1  ;;  %1926 = vpow2.f32 %v1092_v55  ;;  %v1022_v42 = vmul.f32 %v2535_v36, %v858_v15  ;;  %v831_v43 = vsub.f32 %v697_v18, %v2711_v5  ;;  %v1096_v46 = vmul.f32 1.442695, %v1037_v26 }
 0x18e   : > { %v1903_v8 = vpop.eup %1902  ;;  %999 = vst [vmem:[%s2585_s30 + $0xb8] sm:$0xff] %v1901_v19  ;;  %1928 = vpow2.f32 %v1223_v20  ;;  %v1153_v47 = vmul.f32 %v2537_v37, %v858_v15  ;;  %v859_v48 = vsub.f32 %v815_v27, %v2539_v39  ;;  %v1227_v28 = vmul.f32 1.442695, %v1168_v32 }
 0x18f   : > { %v1905_v12 = vpop.eup %1904  ;;  %1534 = vst [vmem:[%s2585_s30 + $0x1b8] sm:$0xff] %v1903_v8  ;;  %1930 = vpow2.f32 %v932_v61  ;;  %v908_v51 = vmul.f32 %v2533_v35, %v874_v33  ;;  %v936_v53 = vmul.f32 1.442695, %v892_v40  ;;  %v1038_v54 = vmul.f32 %v2535_v36, %v874_v33  ;;  %v2745_v61 = vpop.permute.xlu1 %799 }
 0x190   : > { %v1907_v16 = vpop.eup %1906  ;;  %1567 = vst [vmem:[%s2585_s30 + $0x2b8] sm:$0xff] %v1905_v12  ;;  %1932 = vpow2.f32 %v1062_v2  ;;  %v816_v55 = vsub.f32 %v653_v44, %v2547_v50  ;;  %v1066_v58 = vmul.f32 1.442695, %v1022_v42  ;;  %v1169_v20 = vmul.f32 %v2537_v37, %v874_v33 }
 0x191   : > { %v1909_v22 = vpop.eup %1908  ;;  %984 = vst [vmem:[%s2585_s30 + $0x40] sm:$0xff] %v1907_v16  ;;  %1934 = vpow2.f32 %v1193_v6  ;;  %v875_v59 = vsub.f32 %v831_v43, %v2539_v39  ;;  %v1197_v62 = vmul.f32 1.442695, %v1153_v47  ;;  %v893_v63 = vmul.f32 %v2533_v35, %v859_v48 }
 0x192   : > { %v1911_v29 = vpop.eup %1910  ;;  %1519 = vst [vmem:[%s2585_s30 + $0x140] sm:$0xff] %v1909_v22  ;;  %1936 = vpow2.f32 %v964_v9  ;;  %v968_v1 = vmul.f32 1.442695, %v908_v51  ;;  %v1023_v2 = vmul.f32 %v2535_v36, %v859_v48  ;;  %v832_v3 = vsub.f32 %v701_v56, %v2745_v61 }
 0x193   : > { %v1913_v34 = vpop.eup %1912  ;;  %1552 = vst [vmem:[%s2585_s30 + $0x240] sm:$0xff] %v1911_v29  ;;  %1938 = vpow2.f32 %v1094_v13  ;;  %v1098_v5 = vmul.f32 1.442695, %v1038_v54  ;;  %v1154_v6 = vmul.f32 %v2537_v37, %v859_v48  ;;  %v860_v7 = vsub.f32 %v816_v55, %v2531_v30 }
 0x194   : > { %v1915_v41 = vpop.eup %1914  ;;  %1000 = vst [vmem:[%s2585_s30 + $0xc0] sm:$0xff] %v1913_v34  ;;  %1940 = vpow2.f32 %v1225_v17  ;;  %v1229_v9 = vmul.f32 1.442695, %v1169_v20  ;;  %v909_v23 = vmul.f32 %v2533_v35, %v875_v59  ;;  %v938_v11 = vmul.f32 1.442695, %v893_v63 }
 0x195   : > { %v1917_v45 = vpop.eup %1916  ;;  %1535 = vst [vmem:[%s2585_s30 + $0x1c0] sm:$0xff] %v1915_v41  ;;  %1942 = vpow2.f32 %v934_v25  ;;  %v1039_v12 = vmul.f32 %v2535_v36, %v875_v59  ;;  %v817_v13 = vsub.f32 %v655_v4, %v2547_v50  ;;  %v1068_v16 = vmul.f32 1.442695, %v1023_v2 }
 0x196   : > { %v1919_v49 = vpop.eup %1918  ;;  %1568 = vst [vmem:[%s2585_s30 + $0x2c0] sm:$0xff] %v1917_v45  ;;  %1944 = vpow2.f32 %v1064_v31  ;;  %v1170_v17 = vmul.f32 %v2537_v37, %v875_v59  ;;  %v876_v21 = vsub.f32 %v832_v3, %v2531_v30  ;;  %v1199_v25 = vmul.f32 1.442695, %v1154_v6 }
 0x197   : > { %v1921_v52 = vpop.eup %1920  ;;  %985 = vst [vmem:[%s2585_s30 + $0x48] sm:$0xff] %v1919_v49  ;;  %1946 = vpow2.f32 %v1195_v38  ;;  %v894_v26 = vmul.f32 %v2533_v35, %v860_v7  ;;  %v970_v50 = vmul.f32 1.442695, %v909_v23  ;;  %v1024_v18 = vmul.f32 %v2535_v36, %v860_v7 }
 0x198   : > { %v1923_v57 = vpop.eup %1922  ;;  %1520 = vst [vmem:[%s2585_s30 + $0x148] sm:$0xff] %v1921_v52  ;;  %1948 = vpow2.f32 %v966_v24  ;;  %v833_v29 = vsub.f32 %v703_v14, %v2745_v61  ;;  %v1100_v30 = vmul.f32 1.442695, %v1039_v12  ;;  %v1155_v32 = vmul.f32 %v2537_v37, %v860_v7 }
 0x199   : > { %v1925_v60 = vpop.eup %1924  ;;  %1553 = vst [vmem:[%s2585_s30 + $0x248] sm:$0xff] %v1923_v57  ;;  %1950 = vpow2.f32 %v1096_v46  ;;  %v861_v33 = vsub.f32 %v817_v13, %v2539_v39  ;;  %v1231_v38 = vmul.f32 1.442695, %v1170_v17  ;;  %v910_v40 = vmul.f32 %v2533_v35, %v876_v21 }
 0x19a   : > { %v1927_v0 = vpop.eup %1926  ;;  %1001 = vst [vmem:[%s2585_s30 + $0xc8] sm:$0xff] %v1925_v60  ;;  %1952 = vpow2.f32 %v1227_v28  ;;  %v940_v24 = vmul.f32 1.442695, %v894_v26  ;;  %v1040_v42 = vmul.f32 %v2535_v36, %v876_v21  ;;  %v1070_v44 = vmul.f32 1.442695, %v1024_v18 }
 0x19b   : > { %v1929_v19 = vpop.eup %1928  ;;  %1536 = vst [vmem:[%s2585_s30 + $0x1c8] sm:$0xff] %v1927_v0  ;;  %1954 = vpow2.f32 %v936_v53  ;;  %v1171_v45 = vmul.f32 %v2537_v37, %v876_v21  ;;  %v877_v46 = vsub.f32 %v833_v29, %v2539_v39  ;;  %v1201_v48 = vmul.f32 1.442695, %v1155_v32 }
 0x19c   : > { %v1931_v8 = vpop.eup %1930  ;;  %1569 = vst [vmem:[%s2585_s30 + $0x2c8] sm:$0xff] %v1929_v19  ;;  %1956 = vpow2.f32 %v1066_v58  ;;  %v895_v49 = vmul.f32 %v2533_v35, %v861_v33  ;;  %v972_v51 = vmul.f32 1.442695, %v910_v40  ;;  %v1025_v52 = vmul.f32 %v2535_v36, %v861_v33 }
 0x19d   : > { %v1933_v10 = vpop.eup %1932  ;;  %986 = vst [vmem:[%s2585_s30 + $0x50] sm:$0xff] %v1931_v8  ;;  %1958 = vpow2.f32 %v1197_v62  ;;  %v1102_v54 = vmul.f32 1.442695, %v1040_v42  ;;  %v1156_v39 = vmul.f32 %v2537_v37, %v861_v33  ;;  %v1233_v56 = vmul.f32 1.442695, %v1171_v45 }
 0x19e   : > { %v1935_v15 = vpop.eup %1934  ;;  %1521 = vst [vmem:[%s2585_s30 + $0x150] sm:$0xff] %v1933_v10  ;;  %1960 = vpow2.f32 %v968_v1  ;;  %v911_v57 = vmul.f32 %v2533_v35, %v877_v46  ;;  %v942_v20 = vmul.f32 1.442695, %v895_v49  ;;  %v1041_v59 = vmul.f32 %v2535_v36, %v877_v46 }
 0x19f   : > { %v1937_v22 = vpop.eup %1936  ;;  %1554 = vst [vmem:[%s2585_s30 + $0x250] sm:$0xff] %v1935_v15  ;;  %1962 = vpow2.f32 %v1098_v5  ;;  %v1072_v61 = vmul.f32 1.442695, %v1025_v52  ;;  %v1172_v62 = vmul.f32 %v2537_v37, %v877_v46  ;;  %v1203_v35 = vmul.f32 1.442695, %v1156_v39 }
 0x1a0   : > { %v1939_v27 = vpop.eup %1938  ;;  %1002 = vst [vmem:[%s2585_s30 + $0xd0] sm:$0xff] %v1937_v22  ;;  %1964 = vpow2.f32 %v1229_v9  ;;  %v974_v1 = vmul.f32 1.442695, %v911_v57  ;;  %v1104_v36 = vmul.f32 1.442695, %v1041_v59 }
 0x1a1   : > { %v1941_v31 = vpop.eup %1940  ;;  %1537 = vst [vmem:[%s2585_s30 + $0x1d0] sm:$0xff] %v1939_v27  ;;  %1966 = vpow2.f32 %v938_v11  ;;  %v1235_v37 = vmul.f32 1.442695, %v1172_v62 }
 0x1a2   : > { %v1943_v34 = vpop.eup %1942  ;;  %1570 = vst [vmem:[%s2585_s30 + $0x2d0] sm:$0xff] %v1941_v31  ;;  %1968 = vpow2.f32 %v1068_v16 }
 0x1a3   : > { %v1945_v41 = vpop.eup %1944  ;;  %987 = vst [vmem:[%s2585_s30 + $0x58] sm:$0xff] %v1943_v34  ;;  %1970 = vpow2.f32 %v1199_v25 }
 0x1a4   : > { %v1947_v43 = vpop.eup %1946  ;;  %1522 = vst [vmem:[%s2585_s30 + $0x158] sm:$0xff] %v1945_v41  ;;  %1972 = vpow2.f32 %v970_v50 }
 0x1a5   : > { %v1949_v47 = vpop.eup %1948  ;;  %1555 = vst [vmem:[%s2585_s30 + $0x258] sm:$0xff] %v1947_v43  ;;  %1974 = vpow2.f32 %v1100_v30 }
 0x1a6   : > { %v1951_v28 = vpop.eup %1950  ;;  %1003 = vst [vmem:[%s2585_s30 + $0xd8] sm:$0xff] %v1949_v47  ;;  %1976 = vpow2.f32 %v1231_v38 }
 0x1a7   : > { %v1953_v53 = vpop.eup %1952  ;;  %1538 = vst [vmem:[%s2585_s30 + $0x1d8] sm:$0xff] %v1951_v28  ;;  %1978 = vpow2.f32 %v940_v24 }
 0x1a8   : > { %v1955_v55 = vpop.eup %1954  ;;  %1571 = vst [vmem:[%s2585_s30 + $0x2d8] sm:$0xff] %v1953_v53  ;;  %1980 = vpow2.f32 %v1070_v44 }
 0x1a9   : > { %v1957_v58 = vpop.eup %1956  ;;  %988 = vst [vmem:[%s2585_s30 + $0x60] sm:$0xff] %v1955_v55  ;;  %1982 = vpow2.f32 %v1201_v48 }
 0x1aa   : > { %v1959_v60 = vpop.eup %1958  ;;  %1523 = vst [vmem:[%s2585_s30 + $0x160] sm:$0xff] %v1957_v58  ;;  %1984 = vpow2.f32 %v972_v51 }
 0x1ab   : > { %v1961_v63 = vpop.eup %1960  ;;  %1556 = vst [vmem:[%s2585_s30 + $0x260] sm:$0xff] %v1959_v60  ;;  %1986 = vpow2.f32 %v1102_v54 }
 0x1ac   : > { %v1963_v0 = vpop.eup %1962  ;;  %1004 = vst [vmem:[%s2585_s30 + $0xe0] sm:$0xff] %v1961_v63  ;;  %1988 = vpow2.f32 %v1233_v56 }
 0x1ad   : > { %v1965_v2 = vpop.eup %1964  ;;  %1539 = vst [vmem:[%s2585_s30 + $0x1e0] sm:$0xff] %v1963_v0  ;;  %1990 = vpow2.f32 %v942_v20 }
 0x1ae   : > { %v1967_v3 = vpop.eup %1966  ;;  %1572 = vst [vmem:[%s2585_s30 + $0x2e0] sm:$0xff] %v1965_v2  ;;  %1992 = vpow2.f32 %v1072_v61 }
 0x1af   : > { %v1969_v4 = vpop.eup %1968  ;;  %989 = vst [vmem:[%s2585_s30 + $0x68] sm:$0xff] %v1967_v3  ;;  %1994 = vpow2.f32 %v1203_v35 }
 0x1b0   : > { %v1971_v19 = vpop.eup %1970  ;;  %1524 = vst [vmem:[%s2585_s30 + $0x168] sm:$0xff] %v1969_v4  ;;  %1996 = vpow2.f32 %v974_v1 }
 0x1b1   : > { %v1973_v5 = vpop.eup %1972  ;;  %1557 = vst [vmem:[%s2585_s30 + $0x268] sm:$0xff] %v1971_v19  ;;  %1998 = vpow2.f32 %v1104_v36 }
 0x1b2   : > { %v1975_v6 = vpop.eup %1974  ;;  %1005 = vst [vmem:[%s2585_s30 + $0xe8] sm:$0xff] %v1973_v5  ;;  %2000 = vpow2.f32 %v1235_v37 }
 0x1b3   : > { %v1977_v7 = vpop.eup %1976  ;;  %1540 = vst [vmem:[%s2585_s30 + $0x1e8] sm:$0xff] %v1975_v6 }
 0x1b4   : > { %v1979_v8 = vpop.eup %1978  ;;  %1573 = vst [vmem:[%s2585_s30 + $0x2e8] sm:$0xff] %v1977_v7 }
 0x1b5   : > { %v1981_v9 = vpop.eup %1980  ;;  %990 = vst [vmem:[%s2585_s30 + $0x70] sm:$0xff] %v1979_v8 }
 0x1b6   : > { %v1983_v23 = vpop.eup %1982  ;;  %1525 = vst [vmem:[%s2585_s30 + $0x170] sm:$0xff] %v1981_v9 }
 0x1b7   : > { %v1985_v10 = vpop.eup %1984  ;;  %1558 = vst [vmem:[%s2585_s30 + $0x270] sm:$0xff] %v1983_v23 }
 0x1b8   : > { %v1987_v11 = vpop.eup %1986  ;;  %1006 = vst [vmem:[%s2585_s30 + $0xf0] sm:$0xff] %v1985_v10 }
 0x1b9   : > { %v1989_v12 = vpop.eup %1988  ;;  %1541 = vst [vmem:[%s2585_s30 + $0x1f0] sm:$0xff] %v1987_v11 }
 0x1ba   : > { %v1991_v13 = vpop.eup %1990  ;;  %1574 = vst [vmem:[%s2585_s30 + $0x2f0] sm:$0xff] %v1989_v12 }
 0x1bb   : > { %v1993_v14 = vpop.eup %1992  ;;  %991 = vst [vmem:[%s2585_s30 + $0x78] sm:$0xff] %v1991_v13 }
 0x1bc   : > { %v1995_v15 = vpop.eup %1994  ;;  %1526 = vst [vmem:[%s2585_s30 + $0x178] sm:$0xff] %v1993_v14 }
 0x1bd   : > { %v1997_v16 = vpop.eup %1996  ;;  %1559 = vst [vmem:[%s2585_s30 + $0x278] sm:$0xff] %v1995_v15 }
 0x1be   : > { %v1999_v17 = vpop.eup %1998  ;;  %1007 = vst [vmem:[%s2585_s30 + $0xf8] sm:$0xff] %v1997_v16 }
 0x1bf   : > { %v2001_v21 = vpop.eup %2000  ;;  %1542 = vst [vmem:[%s2585_s30 + $0x1f8] sm:$0xff] %v1999_v17 }
 0x1c0   : > { %1575 = vst [vmem:[%s2585_s30 + $0x2f8] sm:$0xff] %v2001_v21 }
 0x1c1   : > { %s2902_s29 = sld [smem:[#allocation15_spill]]  ;;  %s1577_s14 = sshll.u32 %s2123_s24, 1 }
 0x1c2   : > { %s1583_s7 = sshll.u32 %s2127_s25, 6  ;;  %s1297_s17 = sshll.u32 %s2585_s30, 4  ;;  %s1298_s17 = int_to_ptr.vmem [resolvable:$true] %s1297_s17 }
 0x1c3   : > { %s1284_s16 = sadd.s32 %s1583_s7, %s1577_s14  ;;  %s2903_s5 = sld [smem:[#allocation20_spill]] }
 0x1c4   : > { %s1579_s12 = sshll.u32 %s1284_s16, 7  ;;  %s2144_s9 = smov 4096  }
 0x1c5   : > { %s2145_s19 = smov 32768   ;;  %s2146_s8 = smov 16  }
 0x1c6   : > { %s2147_s24 = smov 256   ;;  %s2148_s25 = smov 512  }
 0x1c7   : > { %p2904_p4 = scmp.ne.s32.totalorder %s2902_s29, 0  ;;  %s2149_s6 = smov 131072  }
 0x1c8   : > { %s2150_s18 = smov 0  }
 0x1c9   : > { %s1286_s0 = scalar_lea.hbm %s2903_s5, %s1579_s12  ;;  %1687 = sst [smem:[#allocation9]] (%p2904_p4), %s2144_s9 }
 0x1ca   : > { %1688 = sst [smem:[#allocation9 + $0x1]] (%p2904_p4), %s2145_s19 }
 0x1cb   : > { %1689 = sst [smem:[#allocation9 + $0x2]] (%p2904_p4), %s2146_s8 }
 0x1cc   : > { %1690 = sst [smem:[#allocation9 + $0x3]] (%p2904_p4), %s2147_s24 }
 0x1cd   : > { %1691 = sst [smem:[#allocation9 + $0x4]] (%p2904_p4), %s2148_s25 }
 0x1ce   : > { %1692 = sst [smem:[#allocation9 + $0x5]] (%p2904_p4), %s2146_s8 }
 0x1cf   : > { %1693 = dma.general (%p2904_p4), %s1298_s17, 12288, %s1286_s0, %s1271_s10, %s2149_s6, [#allocation9], %s2150_s18, 0  }
 0x1d0 PF: > { %s2905_s30 = sld [smem:[#allocation13_spill]]  ;;  %p1710_p10 = scmp.ge.s32.totalorder %s2139_s28, 2 }
 0x1d1   : > { %s2906_s14 = sld [smem:[#allocation16_spill]] }
 0x1d6   : > { %s1325_s7 = sand.u32 1, %s2905_s30  }
 0x1d7   : > { %p2907_p11 = scmp.ne.s32.totalorder %s2906_s14, 0  ;;  %s1326_s16 = scalar_lea.sflag [#allocation4], %s1325_s7 }
 0x1d9   : > { %p1704_p8 = pnand %p1710_p10, %p2907_p11 }
 0x1db   : > { %p1705_p9 = pneg %p1704_p8 }
 0x1dd   : > { %2094 = dma.done.wait (%p1705_p9), %s1326_s16, 12288  }
 0x1de   : > { %2096 = vsyncadd (%p1705_p9), %s1326_s16, 4294955008  ;;  %s22_s28 = sadd.s32 1, %s2139_s28   ;;  %s2908_s18 = sld [smem:[#allocation14_spill]] }
 0x1df   : > { %p19_p13 = scmp.ge.s32.totalorder %s22_s28, 10   ;;  %s2909_s10 = sld [smem:[#allocation18_spill]] }
 0x1e0   : > { %s2910_s29 = sld [smem:[#allocation17_spill]]  ;;  %s2911_s19 = smov %s2107_s20 }
 0x1e1   : > { %s2912_s20 = smov %s2298_s11  ;;  %s2913_s21 = smov %s2115_s22 }
 0x1e2   : > { %s2914_s22 = smov %s2119_s23  ;;  %s2916_s24 = smov %s2131_s26 }
 0x1e3   : > { %s2917_s25 = smov %s2135_s27  ;;  %s2919_s27 = smov %s2925_s15 }
 0x1e4   :  { %21 = sbr.rel (!%p19_p13) target bundleno = 13 (0xd), region = 106 }
 0x1e5   : > { %s2915_s23 = smov %s2909_s10 }
 0x1e6   : > { %s2918_s26 = smov %s2910_s29 }
 0x1e9   :  { %1331 = vsyncpa [#allocation3], 1 }
 0x1ea   :  { %1333 = vsyncpa [#allocation3 + $0x1], 1 }
 0x1eb   :  { %1334 = vsyncpa [#allocation4], 1 }
 0x1ec   :  { %1336 = vsyncpa [#allocation4 + $0x1], 1 }
 0x1ed   :  { %1337 = vsyncpa [#allocation5], 1 }
 0x1ee   :  { %1339 = vsyncpa [#allocation5 + $0x1], 1 }

</bundles_post_ra>
